<compile_context>
chip_gen: v7x
topology: tpu7x:2x2x1
jax: 0.10.0
libtpu: 0.0.40
codegen_flags: <defaults>
</compile_context>

<pallas_src>
import jax
import jax.numpy as jnp
from jax.experimental import pallas as pl
from jax.experimental.pallas import tpu as pltpu


def _round_up(x, m):
    return ((x + m - 1) // m) * m


def _circle_collision_kernel(weight_ref, pos_ref, spheres_ref, out_ref):
    # weight_ref:  SMEM (1,) f32
    # pos_ref:     VMEM (2, TILE_N) f32, rows = [x, y], points lane-dense
    # spheres_ref: VMEM (S_pad, 3) f32, rows = spheres, cols = [cx, cy, r]
    # out_ref:     VMEM (1, TILE_N) f32
    w = weight_ref[0]

    px = pos_ref[0:1, :]          # (1, TILE_N)
    py = pos_ref[1:2, :]          # (1, TILE_N)

    tile_n = pos_ref.shape[1]
    s_pad = spheres_ref.shape[0]
    n_chunks = s_pad // 8         # spheres processed 8 sublanes at a time

    acc = jnp.zeros((1, tile_n), jnp.float32)
    for c in range(n_chunks):
        sph = spheres_ref[c * 8:(c + 1) * 8, :]   # (8, 3) static slice
        cx = sph[:, 0:1]                          # (8, 1)
        cy = sph[:, 1:2]
        r = sph[:, 2:3]

        dx = px - cx                              # (8, TILE_N)
        dy = py - cy
        dist = jnp.sqrt(dx * dx + dy * dy) - r    # (8, TILE_N)

        # dist[dist > 0] = 0 ; dist *= -1   ==   max(0, -dist)
        pen = jnp.maximum(-dist, 0.0)
        acc = acc + jnp.sum(pen, axis=0, keepdims=True)   # sublane reduce -> (1, TILE_N)

    out_ref[...] = w * acc


def circle_collision_cost(pos_seq, world_spheres, weight, *, tile_n=2048):
    """pos_seq: (B, H, 2) f32, world_spheres: (S, 3) f32 [x, y, radius], weight: scalar."""
    B, H, _ = pos_seq.shape
    N = B * H
    S = world_spheres.shape[0]

    # Points on lanes: (2, N) with rows [x, y].
    pos_t = jnp.transpose(pos_seq.reshape(N, 2).astype(jnp.float32), (1, 0))  # (2, N)

    # Pad N to a lane-aligned tile multiple (padded points are sliced off later).
    n128 = _round_up(N, 128)
    tile_n = min(tile_n, n128)
    n_pad = _round_up(n128, tile_n)
    if n_pad != N:
        pos_t = jnp.pad(pos_t, ((0, 0), (0, n_pad - N)))

    # Spheres on sublanes: (S_pad, 3); padded rows are inert (radius = -1e30
    # makes dist hugely positive -> zero penetration).
    s_pad = _round_up(max(S, 1), 8)
    spheres = world_spheres.astype(jnp.float32)
    if s_pad != S:
        pad_rows = jnp.concatenate(
            [jnp.zeros((s_pad - S, 2), jnp.float32),
             jnp.full((s_pad - S, 1), -1e30, jnp.float32)], axis=-1)
        spheres = jnp.concatenate([spheres, pad_rows], axis=0)

    w = jnp.asarray([weight], dtype=jnp.float32)   # (1,) scalar in SMEM

    grid = (n_pad // tile_n,)
    out = pl.pallas_call(
        _circle_collision_kernel,
        out_shape=jax.ShapeDtypeStruct((1, n_pad), jnp.float32),
        grid=grid,
        in_specs=[
            pl.BlockSpec(memory_space=pltpu.SMEM),               # weight scalar
            pl.BlockSpec((2, tile_n), lambda i: (0, i)),          # positions tile
            pl.BlockSpec((s_pad, 3), lambda i: (0, 0)),           # spheres, resident
        ],
        out_specs=pl.BlockSpec((1, tile_n), lambda i: (0, i)),    # lane-dense output
        compiler_params=pltpu.CompilerParams(
            dimension_semantics=("parallel",)),                   # v7x: 2 TCs split the grid
    )(w, pos_t, spheres)

    return out[0, :N].reshape(B, H)


def _reference(pos_seq, world_spheres, weight):
    B, H, _ = pos_seq.shape
    pos = pos_seq.reshape(B * H, 2)
    diff = pos[:, None, :] - world_spheres[None, :, :2]        # (N, S, 2)
    dist = jnp.linalg.norm(diff, axis=-1) - world_spheres[None, :, 2]
    dist = jnp.where(dist > 0.0, 0.0, dist) * -1.0
    return (weight * dist.sum(-1)).reshape(B, H)


if __name__ == "__main__":
    key = jax.random.PRNGKey(0)

    B, H = 2, 8
    S = 5  # number of world collision spheres

    # Deterministic synthetic "world model" (stand-in for the YAML collision file).
    # TODO(synk): GaussianProjection / t_mat in the original module do not affect
    # the forward output, so they are intentionally not reproduced here.
    sphere_centers = jnp.array(
        [[0.5, 0.5],
         [-0.4, 0.3],
         [0.1, -0.6],
         [-0.7, -0.2],
         [0.8, -0.8]], dtype=jnp.float32)
    sphere_radii = jnp.array([[0.3], [0.25], [0.4], [0.2], [0.35]], dtype=jnp.float32)
    world_spheres = jnp.concatenate([sphere_centers, sphere_radii], axis=-1)  # (S, 3)

    weight = 1.5

    pos_seq = jax.random.normal(key, (B, H, 2), dtype=jnp.float32) * 0.8

    cost = circle_collision_cost(pos_seq, world_spheres, weight)
    cost = jax.block_until_ready(cost)

    ref = _reference(pos_seq, world_spheres, weight)
    assert cost.shape == (B, H)
    assert jnp.allclose(cost, ref, atol=1e-5, rtol=1e-5), (cost, ref)

    print("KERNEL_OK")
</pallas_src>

<mosaic_0001>
module attributes {stable_mosaic.version = 11 : i64} {
  func.func @_circle_collision_kernel(%arg0: i32, %arg1: memref<1xf32, #tpu.memory_space<smem>>, %arg2: memref<2x128xf32, #tpu.memory_space<vmem>>, %arg3: memref<8x3xf32, #tpu.memory_space<vmem>>, %arg4: memref<1x128xf32, #tpu.memory_space<vmem>>) attributes {dimension_semantics = [#tpu.dimension_semantics<parallel>], iteration_bounds = array<i64: 1>, scalar_prefetch = 0 : i64, scratch_operands = 0 : i64, tpu.core_type = #tpu.core_type<tc>, window_params = [{transform_indices = @transform_0, window_bounds = array<i64: 1>}, {transform_indices = @transform_1, window_bounds = array<i64: 2, 128>}, {pipeline_mode = #tpu.pipeline_mode<synchronous>, transform_indices = @transform_2, window_bounds = array<i64: 8, 3>}, {transform_indices = @transform_3, window_bounds = array<i64: 1, 128>}]} {
    %c0 = arith.constant 0 : index
    %0 = memref.load %arg1[%c0] : memref<1xf32, #tpu.memory_space<smem>>
    %c0_0 = arith.constant 0 : index
    %c0_1 = arith.constant 0 : index
    %1 = vector.load %arg2[%c0_0, %c0_1] : memref<2x128xf32, #tpu.memory_space<vmem>>, vector<1x128xf32>
    %c1 = arith.constant 1 : index
    %c0_2 = arith.constant 0 : index
    %2 = vector.load %arg2[%c1, %c0_2] : memref<2x128xf32, #tpu.memory_space<vmem>>, vector<1x128xf32>
    %cst = arith.constant 0.000000e+00 : f32
    %3 = vector.broadcast %cst : f32 to vector<1x128xf32>
    %c0_3 = arith.constant 0 : index
    %c0_4 = arith.constant 0 : index
    %4 = vector.load %arg3[%c0_3, %c0_4] : memref<8x3xf32, #tpu.memory_space<vmem>>, vector<8x3xf32>
    %5 = vector.extract_strided_slice %4 {offsets = [0, 0], sizes = [8, 1], strides = [1, 1]} : vector<8x3xf32> to vector<8x1xf32>
    %6 = vector.extract_strided_slice %4 {offsets = [0, 1], sizes = [8, 1], strides = [1, 1]} : vector<8x3xf32> to vector<8x1xf32>
    %7 = vector.extract_strided_slice %4 {offsets = [0, 2], sizes = [8, 1], strides = [1, 1]} : vector<8x3xf32> to vector<8x1xf32>
    %8 = vector.broadcast %1 : vector<1x128xf32> to vector<8x128xf32>
    %9 = vector.broadcast %5 : vector<8x1xf32> to vector<8x128xf32>
    %10 = arith.subf %8, %9 : vector<8x128xf32>
    %11 = vector.broadcast %2 : vector<1x128xf32> to vector<8x128xf32>
    %12 = vector.broadcast %6 : vector<8x1xf32> to vector<8x128xf32>
    %13 = arith.subf %11, %12 : vector<8x128xf32>
    %14 = arith.mulf %10, %10 : vector<8x128xf32>
    %15 = arith.mulf %13, %13 : vector<8x128xf32>
    %16 = arith.addf %14, %15 : vector<8x128xf32>
    %17 = math.sqrt %16 : vector<8x128xf32>
    %18 = vector.broadcast %7 : vector<8x1xf32> to vector<8x128xf32>
    %19 = arith.subf %17, %18 : vector<8x128xf32>
    %cst_5 = arith.constant 0.000000e+00 : f32
    %20 = vector.broadcast %cst_5 : f32 to vector<8x128xf32>
    %21 = arith.subf %20, %19 : vector<8x128xf32>
    %cst_6 = arith.constant 0.000000e+00 : f32
    %22 = vector.broadcast %cst_6 : f32 to vector<8x128xf32>
    %23 = arith.maximumf %21, %22 : vector<8x128xf32>
    %cst_7 = arith.constant dense<0.000000e+00> : vector<128xf32>
    %24 = vector.multi_reduction <add>, %23, %cst_7 [0] : vector<8x128xf32> to vector<128xf32>
    %25 = vector.shape_cast %24 : vector<128xf32> to vector<1x128xf32>
    %26 = arith.addf %3, %25 : vector<1x128xf32>
    %27 = vector.broadcast %0 : f32 to vector<1x128xf32>
    %28 = arith.mulf %27, %26 : vector<1x128xf32>
    %c0_8 = arith.constant 0 : index
    %c0_9 = arith.constant 0 : index
    %29 = vector.load %arg4[%c0_8, %c0_9] : memref<1x128xf32, #tpu.memory_space<vmem>>, vector<1x128xf32>
    tpu.vector_store %arg4[%c0_8, %c0_9], %28 {strides = array<i32>} : memref<1x128xf32, #tpu.memory_space<vmem>>, vector<1x128xf32>,
    return
  }
  func.func @transform_0(%arg0: i32) -> i32 {
    %c0_i32 = arith.constant 0 : i32
    %c0_i32_0 = arith.constant 0 : i32
    return %c0_i32 : i32
  }
  func.func @transform_1(%arg0: i32) -> (i32, i32) {
    %c0_i32 = arith.constant 0 : i32
    %c0_i32_0 = arith.constant 0 : i32
    return %c0_i32, %arg0 : i32, i32
  }
  func.func @transform_2(%arg0: i32) -> (i32, i32) {
    %c0_i32 = arith.constant 0 : i32
    %c0_i32_0 = arith.constant 0 : i32
    %c0_i32_1 = arith.constant 0 : i32
    return %c0_i32, %c0_i32_0 : i32, i32
  }
  func.func @transform_3(%arg0: i32) -> (i32, i32) {
    %c0_i32 = arith.constant 0 : i32
    %c0_i32_0 = arith.constant 0 : i32
    return %c0_i32, %arg0 : i32, i32
  }
}

</mosaic_0001>

<bundles_post_ra>
// kernel: tpu_custom_call.1
= control target key start
LH: loop header
LB: loop body
LE: loop exit
PB: predicated region body
PF: predicated region fallthrough
CT: control target
= control target key end

     0   :  { %s164_s0 = inlined_call_operand.<no memory space> [shape: f32[1], index: 0, kind: input, shape index: {}]   ;;  %s165_s1 = inlined_call_operand.vmem [shape: f32[2,128], index: 1, kind: input, shape index: {}]   ;;  %s166_s2 = inlined_call_operand.vmem [shape: f32[8,3], index: 2, kind: input, shape index: {}]   ;;  %s167_s3 = inlined_call_operand.hbm [shape: f32[1,128], index: 3, kind: output, shape index: {}]  }
   0x1   :  { %v19_v0 = vld [vmem:[%s166_s2] sm:$0xff] }
   0x2   :  { %9 = vsyncpa [#allocation4], 0  ;;  %v116_v1 = vmov 0   ;;  %v117_v2 = vmov 2   ;;  %v118_v3 = vmov 1   ;;  %v63_v27 = vstv %s164_s0  ;;  %s119_s18 = smov [#allocation3]  }
   0x3   :  { %86 = vset.pattern.permute.xlu0 %v116_v1  ;;  %88 = vset.pattern.permute.xlu1 %v117_v2  ;;  %v80_v5 = vld [vmem:[%s165_s1] ss:$0 sm:$0xff]  ;;  %v81_v6 = vld [vmem:[%s165_s1 + $0x1] ss:$0 sm:$0xff]  ;;  %s72_s19 = sshll.u32 %s119_s18, 4  ;;  %s73_s19 = int_to_ptr.vmem [resolvable:$true] %s72_s19 }
   0x4   :  { %26 = vperm.xlu0 %86, %v19_v0   ;;  %50 = vperm.xlu1 %88, %v19_v0   ;;  %s92_s20 = scalar_lea.vmem %s73_s19, 16  ;;  %s96_s21 = scalar_lea.vmem %s73_s19, 32 }
   0x5   :  { %p93_p0 = scmp.ne.s32.totalorder %s73_s19, %s92_s20  ;;  %p97_p1 = scmp.lt.s32.totalorder %s73_s19, %s73_s19 }
   0x6   :  { %p98_p2 = scmp.lt.s32.totalorder %s96_s21, %s92_s20 }
   0x8   :  { %87 = vset.pattern.permute.xlu0 %v118_v3  ;;  %p99_p3 = por %p98_p2, %p97_p1 }
   0x9   :  { %35 = vperm.xlu0 %87, %v19_v0  }
   0xa   :  { %p100_p4 = pnand %p99_p3, %p93_p0 }
   0xd   :  { %89 = vset.pattern.permute.xlu0 %v117_v2 }
  0x83   :  { %v27_v4 = vpop.permute.xlu0 %26  ;;  %v51_v15 = vpop.permute.xlu1 %50 }
  0x84   :  { %v29_v7 = vsub.f32 %v80_v5, %v27_v4 }
  0x86   :  { %v39_v10 = vmul.f32 %v29_v7, %v29_v7 }
  0x88   :  { %v36_v8 = vpop.permute.xlu0 %35 }
  0x89   :  { %v38_v9 = vsub.f32 %v81_v6, %v36_v8 }
  0x8b   :  { %v40_v11 = vmul.f32 %v38_v9, %v38_v9 }
  0x8d   :  { %v41_v12 = vadd.f32 %v40_v11, %v39_v10 }
  0x8f   :  { %90 = vrsqrt.f32 %v41_v12  ;;  %vm44_vm0 = vcmp.eq.f32.partialorder %v41_v12, inf  ;;  %v47_v16 = vand.u32 2147483648, %v41_v12  ;;  %vm46_vm1 = vcmp.eq.f32.partialorder %v41_v12, 0.0 }
  0x99   :  { %v91_v13 = vpop.eup %90 }
  0x9a   :  { %v43_v14 = vmul.f32 %v91_v13, %v41_v12 }
  0x9c   :  { %v45_v17 = vsel %vm44_vm0, %v41_v12, %v43_v14 }
  0x9d   :  { %v48_v18 = vsel %vm46_vm1, %v47_v16, %v45_v17 }
  0x9e   :  { %v53_v19 = vsub.f32 %v48_v18, %v51_v15 }
  0xa0   :  { %v54_v20 = vsub.f32 0.0, %v53_v19 }
  0xa2   :  { %v55_v21 = vmax.f32 %v54_v20, 0.0 }
  0xa4   :  { %v56_v22 = vrot.slane %v55_v21, 4 }
  0xa6   :  { %v57_v23 = vadd.f32 %v56_v22, %v55_v21 }
  0xa8   :  { %v58_v24 = vrot.slane %v57_v23, 2 }
  0xaa   :  { %v59_v25 = vadd.f32 %v58_v24, %v57_v23 }
  0xac   :  { %v60_v26 = vrot.slane %v59_v25, 1 }
  0xae   :  { %v61_v28 = vadd.f32 %v60_v26, %v59_v25 }
  0xb0   :  { %v64_v29 = vmul.f32 %v63_v27, %v61_v28 }
  0xb2   :  { %65 = vst [vmem:[#allocation3] sm:$0x1] %v64_v29 }
  0xb3   :  { %103 = shalt.err (!%p100_p4)
}
  0xb4   :  { %s104_s24 = scalar_lea.hbm %s167_s3, 16 }
  0xb5   :  { %p105_p5 = scmp.ne.s32.totalorder %s167_s3, %s104_s24  ;;  %p108_p6 = scmp.lt.u32.totalorder %s104_s24, %s167_s3 }
  0xb7   :  { %p110_p7 = pnand %p108_p6, %p105_p5 }
  0xb9   :  { %113 = shalt.err (!%p110_p7)
}
  0xba   :  { %75 = dma.vmem_to_hbm [thread:$0]  %s73_s19, 16, %s167_s3, [#allocation4]  }
  0xbb   :  { %114 = dma.done.wait [#allocation4], 16  }
  0xbc   :  { %115 = vsyncadd [#allocation4], 4294967280 }
  0xbd   :  { %79 = vsyncpa [#allocation4], 1 }

</bundles_post_ra>
